<compile_context>
chip_gen: v7x
topology: tpu7x:2x2x1
jax: 0.10.0
libtpu: 0.0.40
codegen_flags: <defaults>
</compile_context>

<pallas_src>
import functools

import jax
import jax.numpy as jnp
from jax import lax
from jax.experimental import pallas as pl
from jax.experimental.pallas import tpu as pltpu

EPS = 1e-5
LANE = 128


def _round_up(n, m):
    return (n + m - 1) // m * m


def _bn_scale_shift(t, gamma, beta, n_valid):
    """Training-mode BN over the lane axis, fused into y = t*scale + shift.

    t: (C, BLpad) f32 whose padded lane columns are exactly zero, so full-slab
    sums equal sums over the n_valid real columns.  One-pass statistics
    (var = E[t^2] - mean^2) in f32; fine unless |mean| >> std.
    """
    inv_n = 1.0 / float(n_valid)
    mean = jnp.sum(t, axis=1, keepdims=True) * inv_n          # (C, 1)
    ex2 = jnp.sum(t * t, axis=1, keepdims=True) * inv_n       # (C, 1)
    var = jnp.maximum(ex2 - mean * mean, 0.0)                 # biased var (PyTorch train)
    scale = gamma * lax.rsqrt(var + EPS)                      # rsqrt -> EUP slot
    shift = beta - mean * scale
    return t * scale + shift


def residual_block_kernel(L, dilation, has_skip_proj, n_valid,
                          x_ref,                    # (Cin,  BLpad)  lane-dense input slab
                          wm_ref, wc_ref, wp_ref,   # (NC, Cin)      per-tap conv1 (+skip) weights
                          g1_ref, be1_ref,          # (NC, 1)        BN1 (+ skip BN) gamma/beta
                          w2_ref,                   # (Cout, Cout)   1x1 conv2 weights
                          g2_ref, be2_ref,          # (Cout, 1)      BN2 gamma/beta
                          o_ref):                   # (Cout, BLpad)  lane-dense output slab
    d = dilation
    Cout = o_ref.shape[0]
    BLpad = x_ref.shape[1]
    f32 = jnp.float32

    x = x_ref[...].astype(f32)                                 # (Cin, BLpad)

    # Lane-position bookkeeping: position within each length-L segment + pad mask.
    pos = lax.broadcasted_iota(jnp.int32, (1, BLpad), 1)
    lpos = pos % L
    valid = pos < n_valid                                      # real (non-pad) columns

    # Dilated-conv taps via XLU lane rotation + cheap selects (no concats/copies):
    #   x_m[:, p] = x[:, p - d]   (0 where l <  d        or p is padding)
    #   x_p[:, p] = x[:, p + d]   (0 where l >= L - d    or p is padding)
    zero = jnp.zeros_like(x)
    x_m = jnp.where((lpos >= d) & valid, pltpu.roll(x, shift=d, axis=1), zero)
    x_p = jnp.where((lpos < L - d) & valid, pltpu.roll(x, shift=BLpad - d, axis=1), zero)

    # Fused first conv (three accumulating dots) + optional 1x1 skip projection:
    #   y[:Cout]  = conv1(x)  (pre-BN; conv bias dropped, cancelled by BN mean)
    #   y[Cout:]  = skip(x)   (only rows present when has_skip_proj)
    y = (jnp.dot(wm_ref[...], x_m, preferred_element_type=f32)
         + jnp.dot(wc_ref[...], x, preferred_element_type=f32)
         + jnp.dot(wp_ref[...], x_p, preferred_element_type=f32))   # (NC, BLpad)

    # BN1 (+ skip BN if fused) as a per-channel scale/shift.
    y = _bn_scale_shift(y, g1_ref[...], be1_ref[...], n_valid)

    h = jnp.maximum(y[:Cout, :], 0.0)                          # conv path: BN1 + ReLU
    # Re-zero padded lanes (the affine shift makes relu(shift) generally non-zero
    # there) so they cannot pollute BN2 statistics.
    h = jnp.where(valid, h, 0.0)

    if has_skip_proj:
        s = y[Cout:, :]                                        # skip: 1x1 conv + BN (no ReLU)
    else:
        s = x                                                  # Identity skip (Cin == Cout)

    # 1x1 conv -> BN -> ReLU.
    h2 = jnp.dot(w2_ref[...], h, preferred_element_type=f32)   # (Cout, BLpad)
    h2 = jnp.maximum(_bn_scale_shift(h2, g2_ref[...], be2_ref[...], n_valid), 0.0)

    # Single lane-dense store of the whole output slab.
    o_ref[...] = (h2 + s).astype(o_ref.dtype)


def residual_block(x_ncl, params, *, dilation=1):
    """x_ncl: (B, Cin, L) in PyTorch NCL layout. Returns (B, Cout, L), same dtype."""
    B, Cin, L = x_ncl.shape
    Cout = params['w1'].shape[0]
    has_skip_proj = (Cin != Cout)
    assert 1 <= dilation < L, "dilation must satisfy 1 <= dilation < L"

    f32 = jnp.float32
    BL = B * L
    BLpad = max(_round_up(BL, LANE), LANE)

    # ---- wrapper-side layout plumbing (XLA fuses; kernel stays lane-dense) ----
    x_slab = jnp.transpose(x_ncl, (1, 0, 2)).reshape(Cin, BL)
    if BLpad != BL:
        x_slab = jnp.pad(x_slab, ((0, 0), (0, BLpad - BL)))

    # Per-tap weight matrices; skip-projection rows appended to the centre tap.
    # Conv1d(k=3, pad=d, dil=d): out[l] = w[...,0]*x[l-d] + w[...,1]*x[l] + w[...,2]*x[l+d].
    w1 = params['w1'].astype(f32)                              # (Cout, Cin, 3)
    wm, wc, wp = w1[:, :, 0], w1[:, :, 1], w1[:, :, 2]
    if has_skip_proj:
        zc = jnp.zeros((Cout, Cin), f32)
        wm = jnp.concatenate([wm, zc], axis=0)                 # (2*Cout, Cin)
        wc = jnp.concatenate([wc, params['ws'][:, :, 0].astype(f32)], axis=0)
        wp = jnp.concatenate([wp, zc], axis=0)
        g1 = jnp.concatenate([params['g1'], params['gs']])
        be1 = jnp.concatenate([params['be1'], params['bes']])
    else:
        g1, be1 = params['g1'], params['be1']
    w2 = params['w2'][:, :, 0].astype(f32)                     # (Cout, Cout)
    col = lambda v: v.reshape(-1, 1).astype(f32)
    nc = wc.shape[0]
    # Conv biases b1/b2/bs are intentionally NOT kernel inputs: training-mode BN's
    # batch-mean subtraction cancels any per-channel constant added by the conv.

    # ---- shape-derived VMEM limit (capped under physical VMEM when known) ----
    slab = 4 * BLpad
    est = slab * (5 * Cin + 3 * nc + 6 * Cout)                 # live (C, BLpad) slabs
    est += 4 * (3 * nc * Cin + Cout * Cout + 2 * nc + 2 * Cout)
    cap = 100 * 1024 * 1024                                    # fine for v5e/v6e scoped VMEM
    try:                                                       # shrink on e.g. v7x (64 MiB)
        phys = getattr(pltpu.get_tpu_info(), "vmem_capacity_bytes", None)
        if phys:
            cap = min(cap, int(phys) * 3 // 4)
    except Exception:
        pass
    vmem_limit = int(min(max(2 * est, 16 * 1024 * 1024), cap))

    cost = pl.CostEstimate(
        flops=2 * BL * (3 * nc * Cin + Cout * Cout),
        transcendentals=nc + Cout,
        bytes_accessed=4 * BL * (Cin + Cout) + 4 * (3 * nc * Cin + Cout * Cout + 2 * nc + 2 * Cout),
    )

    vmem = pl.BlockSpec(memory_space=pltpu.MemorySpace.VMEM)
    kernel = functools.partial(residual_block_kernel, L, dilation, has_skip_proj, BL)
    out_slab = pl.pallas_call(
        kernel,
        out_shape=jax.ShapeDtypeStruct((Cout, BLpad), x_ncl.dtype),
        in_specs=[vmem] * 9,
        out_specs=vmem,
        compiler_params=pltpu.CompilerParams(vmem_limit_bytes=vmem_limit),
        cost_estimate=cost,
    )(x_slab, wm, wc, wp, col(g1), col(be1), w2, col(params['g2']), col(params['be2']))

    # Wrapper-side slab -> NCL (layout plumbing, fused by XLA).
    return jnp.transpose(out_slab[:, :BL].reshape(Cout, B, L), (1, 0, 2))


# ------------------------- pure-JAX reference (NCL) -------------------------
def ref_residual_block(x, params, *, dilation=1):
    def conv1d(x, w, b, dil=1, pad=0):
        y = lax.conv_general_dilated(
            x, w, window_strides=(1,), padding=[(pad, pad)],
            rhs_dilation=(dil,), dimension_numbers=('NCH', 'OIH', 'NCH'))
        return y + b[None, :, None]

    def bn(y, gamma, beta):
        mean = y.mean(axis=(0, 2), keepdims=True)
        var = ((y - mean) ** 2).mean(axis=(0, 2), keepdims=True)
        return (y - mean) / jnp.sqrt(var + EPS) * gamma[None, :, None] + beta[None, :, None]

    h = conv1d(x, params['w1'], params['b1'], dil=dilation, pad=dilation)
    h = jnp.maximum(bn(h, params['g1'], params['be1']), 0.0)
    h = conv1d(h, params['w2'], params['b2'])
    h = jnp.maximum(bn(h, params['g2'], params['be2']), 0.0)
    if x.shape[1] != params['w1'].shape[0]:
        s = bn(conv1d(x, params['ws'], params['bs']), params['gs'], params['bes'])
    else:
        s = x
    return h + s


if __name__ == "__main__":
    f32 = jnp.float32

    def make_params(key, Cin, Cout, with_skip):
        ks = jax.random.split(key, 12)
        p = {
            'w1': 0.2 * jax.random.normal(ks[0], (Cout, Cin, 3), f32),
            'b1': 0.1 * jax.random.normal(ks[1], (Cout,), f32),
            'g1': 1.0 + 0.1 * jax.random.normal(ks[2], (Cout,), f32),
            'be1': 0.1 * jax.random.normal(ks[3], (Cout,), f32),
            'w2': 0.2 * jax.random.normal(ks[4], (Cout, Cout, 1), f32),
            'b2': 0.1 * jax.random.normal(ks[5], (Cout,), f32),
            'g2': 1.0 + 0.1 * jax.random.normal(ks[6], (Cout,), f32),
            'be2': 0.1 * jax.random.normal(ks[7], (Cout,), f32),
        }
        if with_skip:
            p.update({
                'ws': 0.2 * jax.random.normal(ks[8], (Cout, Cin, 1), f32),
                'bs': 0.1 * jax.random.normal(ks[9], (Cout,), f32),
                'gs': 1.0 + 0.1 * jax.random.normal(ks[10], (Cout,), f32),
                'bes': 0.1 * jax.random.normal(ks[11], (Cout,), f32),
            })
        return p

    key = jax.random.PRNGKey(0)
    k1, k2, k3, k4 = jax.random.split(key, 4)

    # Test 1: Cin != Cout -> skip projection + BN (fused into the centre-tap matmul).
    B, Cin, Cout, L, dilation = 2, 4, 8, 16, 2
    params = make_params(k1, Cin, Cout, with_skip=True)
    x = jax.random.normal(k2, (B, Cin, L), f32)
    out = jax.block_until_ready(residual_block(x, params, dilation=dilation))
    ref = ref_residual_block(x, params, dilation=dilation)
    assert out.shape == (B, Cout, L), out.shape
    err1 = float(jnp.max(jnp.abs(out - ref)))
    assert err1 < 1e-4, f"skip-proj variant: max abs error {err1}"

    # Test 2: Cin == Cout -> Identity skip (no skip weights / BN params needed).
    C, L2, dil2 = 8, 16, 1
    params2 = make_params(k3, C, C, with_skip=False)
    x2 = jax.random.normal(k4, (B, C, L2), f32)
    out2 = jax.block_until_ready(residual_block(x2, params2, dilation=dil2))
    ref2 = ref_residual_block(x2, params2, dilation=dil2)
    assert out2.shape == (B, C, L2), out2.shape
    err2 = float(jnp.max(jnp.abs(out2 - ref2)))
    assert err2 < 1e-4, f"identity-skip variant: max abs error {err2}"

    print("KERNEL_OK")
</pallas_src>

<mosaic_0001>
module attributes {stable_mosaic.version = 11 : i64} {
  func.func @residual_block_kernel(%arg0: memref<4x128xf32, #tpu.memory_space<vmem>>, %arg1: memref<16x4xf32, #tpu.memory_space<vmem>>, %arg2: memref<16x4xf32, #tpu.memory_space<vmem>>, %arg3: memref<16x4xf32, #tpu.memory_space<vmem>>, %arg4: memref<16x1xf32, #tpu.memory_space<vmem>>, %arg5: memref<16x1xf32, #tpu.memory_space<vmem>>, %arg6: memref<8x8xf32, #tpu.memory_space<vmem>>, %arg7: memref<8x1xf32, #tpu.memory_space<vmem>>, %arg8: memref<8x1xf32, #tpu.memory_space<vmem>>, %arg9: memref<8x128xf32, #tpu.memory_space<vmem>>) attributes {dimension_semantics = [], scalar_prefetch = 0 : i64, scratch_operands = 0 : i64, tpu.core_type = #tpu.core_type<tc>} {
    %c0 = arith.constant 0 : index
    %c0_0 = arith.constant 0 : index
    %0 = vector.load %arg0[%c0, %c0_0] : memref<4x128xf32, #tpu.memory_space<vmem>>, vector<4x128xf32>
    %1 = tpu.iota {dimensions = array<i32: 1>} : vector<1x128xi32>
    %c16_i32 = arith.constant 16 : i32
    %c0_i32 = arith.constant 0 : i32
    %2 = arith.cmpi eq, %c16_i32, %c0_i32 : i32
    %c1_i32 = arith.constant 1 : i32
    %3 = arith.select %2, %c1_i32, %c16_i32 : i32
    %4 = vector.broadcast %3 : i32 to vector<1x128xi32>
    %5 = arith.remsi %1, %4 : vector<1x128xi32>
    %c0_i32_1 = arith.constant 0 : i32
    %6 = vector.broadcast %c0_i32_1 : i32 to vector<1x128xi32>
    %7 = arith.cmpi ne, %5, %6 : vector<1x128xi32>
    %c0_i32_2 = arith.constant 0 : i32
    %8 = vector.broadcast %c0_i32_2 : i32 to vector<1x128xi32>
    %9 = arith.cmpi slt, %5, %8 : vector<1x128xi32>
    %c0_i32_3 = arith.constant 0 : i32
    %10 = arith.cmpi slt, %3, %c0_i32_3 : i32
    %11 = vector.broadcast %10 : i1 to vector<1x128xi1>
    %12 = vector.broadcast %11 : vector<1x128xi1> to vector<1x128xi1>
    %13 = arith.xori %9, %12 : vector<1x128xi1>
    %14 = arith.andi %13, %7 : vector<1x128xi1>
    %15 = vector.broadcast %3 : i32 to vector<1x128xi32>
    %16 = arith.addi %5, %15 : vector<1x128xi32>
    %17 = arith.select %14, %16, %5 : vector<1x128xi1>, vector<1x128xi32>
    %c32_i32 = arith.constant 32 : i32
    %18 = vector.broadcast %c32_i32 : i32 to vector<1x128xi32>
    %19 = arith.cmpi slt, %1, %18 : vector<1x128xi32>
    %cst = arith.constant 0.000000e+00 : f32
    %20 = vector.broadcast %cst : f32 to vector<4x128xf32>
    %c2_i32 = arith.constant 2 : i32
    %21 = vector.broadcast %c2_i32 : i32 to vector<1x128xi32>
    %22 = arith.cmpi sge, %17, %21 : vector<1x128xi32>
    %23 = arith.andi %22, %19 : vector<1x128xi1>
    %c2_i32_4 = arith.constant 2 : i32
    %24 = tpu.dynamic_rotate %0 by %c2_i32_4 dim 1 : vector<4x128xf32>, i32 -> vector<4x128xf32>
    %25 = vector.shape_cast %23 : vector<1x128xi1> to vector<1x128xi1>
    %26 = vector.broadcast %25 : vector<1x128xi1> to vector<4x128xi1>
    %27 = arith.select %26, %24, %20 : vector<4x128xi1>, vector<4x128xf32>
    %c14_i32 = arith.constant 14 : i32
    %28 = vector.broadcast %c14_i32 : i32 to vector<1x128xi32>
    %29 = arith.cmpi slt, %17, %28 : vector<1x128xi32>
    %30 = arith.andi %29, %19 : vector<1x128xi1>
    %c126_i32 = arith.constant 126 : i32
    %31 = tpu.dynamic_rotate %0 by %c126_i32 dim 1 : vector<4x128xf32>, i32 -> vector<4x128xf32>
    %32 = vector.shape_cast %30 : vector<1x128xi1> to vector<1x128xi1>
    %33 = vector.broadcast %32 : vector<1x128xi1> to vector<4x128xi1>
    %34 = arith.select %33, %31, %20 : vector<4x128xi1>, vector<4x128xf32>
    %c0_5 = arith.constant 0 : index
    %c0_6 = arith.constant 0 : index
    %35 = vector.load %arg1[%c0_5, %c0_6] : memref<16x4xf32, #tpu.memory_space<vmem>>, vector<16x4xf32>
    %cst_7 = arith.constant dense<0.000000e+00> : vector<16x128xf32>
    %36 = tpu.matmul %35, %27, %cst_7 {dimension_numbers = #tpu.dot_dimension_numbers<[1], [0], [0], [1], [0, 0, 1, 1], [], []>} : vector<16x4xf32>, vector<4x128xf32>, vector<16x128xf32> -> vector<16x128xf32>
    %c0_8 = arith.constant 0 : index
    %c0_9 = arith.constant 0 : index
    %37 = vector.load %arg2[%c0_8, %c0_9] : memref<16x4xf32, #tpu.memory_space<vmem>>, vector<16x4xf32>
    %cst_10 = arith.constant dense<0.000000e+00> : vector<16x128xf32>
    %38 = tpu.matmul %37, %0, %cst_10 {dimension_numbers = #tpu.dot_dimension_numbers<[1], [0], [0], [1], [0, 0, 1, 1], [], []>} : vector<16x4xf32>, vector<4x128xf32>, vector<16x128xf32> -> vector<16x128xf32>
    %39 = arith.addf %36, %38 : vector<16x128xf32>
    %c0_11 = arith.constant 0 : index
    %c0_12 = arith.constant 0 : index
    %40 = vector.load %arg3[%c0_11, %c0_12] : memref<16x4xf32, #tpu.memory_space<vmem>>, vector<16x4xf32>
    %cst_13 = arith.constant dense<0.000000e+00> : vector<16x128xf32>
    %41 = tpu.matmul %40, %34, %cst_13 {dimension_numbers = #tpu.dot_dimension_numbers<[1], [0], [0], [1], [0, 0, 1, 1], [], []>} : vector<16x4xf32>, vector<4x128xf32>, vector<16x128xf32> -> vector<16x128xf32>
    %42 = arith.addf %39, %41 : vector<16x128xf32>
    %c0_14 = arith.constant 0 : index
    %c0_15 = arith.constant 0 : index
    %43 = vector.load %arg4[%c0_14, %c0_15] : memref<16x1xf32, #tpu.memory_space<vmem>>, vector<16x1xf32>
    %c0_16 = arith.constant 0 : index
    %c0_17 = arith.constant 0 : index
    %44 = vector.load %arg5[%c0_16, %c0_17] : memref<16x1xf32, #tpu.memory_space<vmem>>, vector<16x1xf32>
    %cst_18 = arith.constant dense<0.000000e+00> : vector<16xf32>
    %45 = vector.multi_reduction <add>, %42, %cst_18 [1] : vector<16x128xf32> to vector<16xf32>
    %46 = vector.shape_cast %45 : vector<16xf32> to vector<16x1xf32>
    %cst_19 = arith.constant 3.125000e-02 : f32
    %47 = vector.broadcast %cst_19 : f32 to vector<16x1xf32>
    %48 = arith.mulf %46, %47 : vector<16x1xf32>
    %49 = arith.mulf %42, %42 : vector<16x128xf32>
    %cst_20 = arith.constant dense<0.000000e+00> : vector<16xf32>
    %50 = vector.multi_reduction <add>, %49, %cst_20 [1] : vector<16x128xf32> to vector<16xf32>
    %51 = vector.shape_cast %50 : vector<16xf32> to vector<16x1xf32>
    %cst_21 = arith.constant 3.125000e-02 : f32
    %52 = vector.broadcast %cst_21 : f32 to vector<16x1xf32>
    %53 = arith.mulf %51, %52 : vector<16x1xf32>
    %54 = arith.mulf %48, %48 : vector<16x1xf32>
    %55 = arith.subf %53, %54 : vector<16x1xf32>
    %cst_22 = arith.constant 0.000000e+00 : f32
    %56 = vector.broadcast %cst_22 : f32 to vector<16x1xf32>
    %57 = arith.maximumf %55, %56 : vector<16x1xf32>
    %cst_23 = arith.constant 9.99999974E-6 : f32
    %58 = vector.broadcast %cst_23 : f32 to vector<16x1xf32>
    %59 = arith.addf %57, %58 : vector<16x1xf32>
    %60 = math.rsqrt %59 : vector<16x1xf32>
    %61 = arith.mulf %43, %60 : vector<16x1xf32>
    %62 = arith.mulf %48, %61 : vector<16x1xf32>
    %63 = arith.subf %44, %62 : vector<16x1xf32>
    %64 = vector.broadcast %61 : vector<16x1xf32> to vector<16x128xf32>
    %65 = arith.mulf %42, %64 : vector<16x128xf32>
    %66 = vector.broadcast %63 : vector<16x1xf32> to vector<16x128xf32>
    %67 = arith.addf %65, %66 : vector<16x128xf32>
    %68 = vector.extract_strided_slice %67 {offsets = [0, 0], sizes = [8, 128], strides = [1, 1]} : vector<16x128xf32> to vector<8x128xf32>
    %cst_24 = arith.constant 0.000000e+00 : f32
    %69 = vector.broadcast %cst_24 : f32 to vector<8x128xf32>
    %70 = arith.maximumf %68, %69 : vector<8x128xf32>
    %cst_25 = arith.constant 0.000000e+00 : f32
    %71 = vector.shape_cast %19 : vector<1x128xi1> to vector<1x128xi1>
    %72 = vector.broadcast %71 : vector<1x128xi1> to vector<8x128xi1>
    %73 = vector.broadcast %cst_25 : f32 to vector<8x128xf32>
    %74 = arith.select %72, %70, %73 : vector<8x128xi1>, vector<8x128xf32>
    %75 = vector.extract_strided_slice %67 {offsets = [8, 0], sizes = [8, 128], strides = [1, 1]} : vector<16x128xf32> to vector<8x128xf32>
    %c0_26 = arith.constant 0 : index
    %c0_27 = arith.constant 0 : index
    %76 = vector.load %arg6[%c0_26, %c0_27] : memref<8x8xf32, #tpu.memory_space<vmem>>, vector<8x8xf32>
    %cst_28 = arith.constant dense<0.000000e+00> : vector<8x128xf32>
    %77 = tpu.matmul %76, %74, %cst_28 {dimension_numbers = #tpu.dot_dimension_numbers<[1], [0], [0], [1], [0, 0, 1, 1], [], []>} : vector<8x8xf32>, vector<8x128xf32>, vector<8x128xf32> -> vector<8x128xf32>
    %c0_29 = arith.constant 0 : index
    %c0_30 = arith.constant 0 : index
    %78 = vector.load %arg7[%c0_29, %c0_30] : memref<8x1xf32, #tpu.memory_space<vmem>>, vector<8x1xf32>
    %c0_31 = arith.constant 0 : index
    %c0_32 = arith.constant 0 : index
    %79 = vector.load %arg8[%c0_31, %c0_32] : memref<8x1xf32, #tpu.memory_space<vmem>>, vector<8x1xf32>
    %cst_33 = arith.constant dense<0.000000e+00> : vector<8xf32>
    %80 = vector.multi_reduction <add>, %77, %cst_33 [1] : vector<8x128xf32> to vector<8xf32>
    %81 = vector.shape_cast %80 : vector<8xf32> to vector<8x1xf32>
    %cst_34 = arith.constant 3.125000e-02 : f32
    %82 = vector.broadcast %cst_34 : f32 to vector<8x1xf32>
    %83 = arith.mulf %81, %82 : vector<8x1xf32>
    %84 = arith.mulf %77, %77 : vector<8x128xf32>
    %cst_35 = arith.constant dense<0.000000e+00> : vector<8xf32>
    %85 = vector.multi_reduction <add>, %84, %cst_35 [1] : vector<8x128xf32> to vector<8xf32>
    %86 = vector.shape_cast %85 : vector<8xf32> to vector<8x1xf32>
    %cst_36 = arith.constant 3.125000e-02 : f32
    %87 = vector.broadcast %cst_36 : f32 to vector<8x1xf32>
    %88 = arith.mulf %86, %87 : vector<8x1xf32>
    %89 = arith.mulf %83, %83 : vector<8x1xf32>
    %90 = arith.subf %88, %89 : vector<8x1xf32>
    %cst_37 = arith.constant 0.000000e+00 : f32
    %91 = vector.broadcast %cst_37 : f32 to vector<8x1xf32>
    %92 = arith.maximumf %90, %91 : vector<8x1xf32>
    %cst_38 = arith.constant 9.99999974E-6 : f32
    %93 = vector.broadcast %cst_38 : f32 to vector<8x1xf32>
    %94 = arith.addf %92, %93 : vector<8x1xf32>
    %95 = math.rsqrt %94 : vector<8x1xf32>
    %96 = arith.mulf %78, %95 : vector<8x1xf32>
    %97 = arith.mulf %83, %96 : vector<8x1xf32>
    %98 = arith.subf %79, %97 : vector<8x1xf32>
    %99 = vector.broadcast %96 : vector<8x1xf32> to vector<8x128xf32>
    %100 = arith.mulf %77, %99 : vector<8x128xf32>
    %101 = vector.broadcast %98 : vector<8x1xf32> to vector<8x128xf32>
    %102 = arith.addf %100, %101 : vector<8x128xf32>
    %cst_39 = arith.constant 0.000000e+00 : f32
    %103 = vector.broadcast %cst_39 : f32 to vector<8x128xf32>
    %104 = arith.maximumf %102, %103 : vector<8x128xf32>
    %105 = arith.addf %104, %75 : vector<8x128xf32>
    %c0_40 = arith.constant 0 : index
    %c0_41 = arith.constant 0 : index
    %106 = vector.load %arg9[%c0_40, %c0_41] : memref<8x128xf32, #tpu.memory_space<vmem>>, vector<8x128xf32>
    tpu.vector_store %arg9[%c0_40, %c0_41], %105 {strides = array<i32>} : memref<8x128xf32, #tpu.memory_space<vmem>>, vector<8x128xf32>,
    return
  }
}

</mosaic_0001>

<bundles_post_ra>
// kernel: tpu_custom_call.1
= control target key start
LH: loop header
LB: loop body
LE: loop exit
PB: predicated region body
PF: predicated region fallthrough
CT: control target
= control target key end

     0   :  { %vm74_vm0 = vcmask 1043456   ;;  %s592_s13 = smov 2   ;;  %vm67_vm1 = vcmask 31744   ;;  %s730_s0 = inlined_call_operand.vmem [shape: f32[4,128], index: 0, kind: input, shape index: {}]   ;;  %s731_s1 = inlined_call_operand.vmem [shape: f32[16,4], index: 1, kind: input, shape index: {}]   ;;  %s732_s2 = inlined_call_operand.vmem [shape: f32[16,4], index: 2, kind: input, shape index: {}]   ;;  %s733_s3 = inlined_call_operand.vmem [shape: f32[16,4], index: 3, kind: input, shape index: {}]   ;;  %s734_s4 = inlined_call_operand.vmem [shape: f32[16,1], index: 4, kind: input, shape index: {}]   ;;  %s735_s5 = inlined_call_operand.vmem [shape: f32[16,1], index: 5, kind: input, shape index: {}]   ;;  %s736_s6 = inlined_call_operand.vmem [shape: f32[8,8], index: 6, kind: input, shape index: {}]   ;;  %s737_s7 = inlined_call_operand.vmem [shape: f32[8,1], index: 7, kind: input, shape index: {}]   ;;  %s738_s8 = inlined_call_operand.vmem [shape: f32[8,1], index: 8, kind: input, shape index: {}]   ;;  %s739_s9 = inlined_call_operand.hbm [shape: f32[8,128], index: 9, kind: output, shape index: {}]  }
   0x1   :  { %v33_v0 = vld [vmem:[%s730_s0] sm:$0xf]  ;;  %v66_v3 = vld [vmem:[%s732_s2 + $0x8] sm:$0xff] }
   0x2   :  { %v63_v1 = vld [vmem:[%s731_s1] sm:$0xff]  ;;  %51 = vrot.lane.b32.xlu0 %v33_v0, %s592_s13  ;;  %530 = vmatprep.subr.msk.mxu1 %vm74_vm0, %v33_v0 }
   0x3   :  { %v65_v2 = vld [vmem:[%s732_s2] sm:$0xff]  ;;  %537 = vmatprep.mubr.msk.f32.mxu0 %vm67_vm1, %v63_v1  ;;  %531 = vmatpush3.msk.msra.mxu1 %vm74_vm0, %v33_v0 }
   0x4   :  { %14 = vsyncpa [#allocation3], 0  ;;  %532 = vmatprep.mubr.msk.f32.mxu1 %vm67_vm1, %v65_v2  ;;  %s593_s0 = smov 126   ;;  %v34_v4 = vlaneseq  ;;  %v64_v9 = vld [vmem:[%s731_s1 + $0x8] sm:$0xff]  ;;  %v237_v10 = vld [vmem:[%s733_s3] sm:$0xff]  ;;  %v594_v21 = vmov 0  }
   0x5   :  { %533 = vmatmul.mubr.msk.f32.vlgmr.msra.gmra.mrb[0].mxu1 %vm67_vm1, %v66_v3  ;;  %v238_v13 = vld [vmem:[%s733_s3 + $0x8] sm:$0xff]  ;;  %560 = vset.pattern.permute.xlu0 %v594_v21  ;;  %v325_v30 = vld [vmem:[%s734_s4] sm:$0xff]  ;;  %v595_v36 = vmov 0.0   ;;  %vm596_vm7 = vmmov 0   ;;  %vm388_vm8 = vcmask 64512  }
   0x6   :  { %58 = vrot.lane.b32.xlu0 %v33_v0, %s593_s0  ;;  %v665_v5 = vand.u32 127, %v34_v4  ;;  %561 = vset.pattern.permute.xlu1 %v594_v21  ;;  %v327_v33 = vld [vmem:[%s735_s5] sm:$0xff]  ;;  %v326_v3 = vld [vmem:[%s734_s4 + $0x8] sm:$0xff]  ;;  %s597_s4 = smov [#allocation2]  }
   0x7   :  { %545 = vmatprep.subr.mxu1 %v595_v36  ;;  %547 = vmatprep.mubr.msk.f32.mxu1 %vm596_vm7, %v595_v36  ;;  %v387_v42 = vld [vmem:[%s736_s6] sm:$0xff] }
   0x8   :  { %v40_v6 = vand.u32 15, %v665_v5  ;;  %vm48_vm2 = vcmp.lt.s32.totalorder %v665_v5, 32  ;;  %v462_v63 = vld [vmem:[%s737_s7] sm:$0xff]  ;;  %s500_s7 = sshll.u32 %s597_s4, 4  ;;  %s501_s7 = int_to_ptr.vmem [resolvable:$true] %s500_s7 }
   0x9   :  { %v463_v2 = vld [vmem:[%s738_s8] sm:$0xff]  ;;  %p573_p1 = scmp.lt.s32.totalorder %s501_s7, %s501_s7 }
   0xa   :  { %vm49_vm3 = vcmp.ge.s32.totalorder %v40_v6, 2  ;;  %vm56_vm5 = vcmp.lt.s32.totalorder %v40_v6, 14 }
   0xb   :  { %vm50_vm4 = vmand %vm49_vm3, %vm48_vm2 }
   0xc   :  { %vm57_vm6 = vmand %vm56_vm5, %vm48_vm2 }
  0x74   :  { %v52_v7 = vpop.permute.xlu0 %51 }
  0x75   :  { %v55_v8 = vsel %vm50_vm4, %v52_v7, 0.0 }
  0x76   :  { %535 = vmatprep.subr.msk.mxu0 %vm74_vm0, %v55_v8 }
  0x77   :  { %536 = vmatpush3.msk.msra.mxu0 %vm74_vm0, %v55_v8  ;;  %v328_v8 = vld [vmem:[%s735_s5 + $0x8] sm:$0xff]  ;;  %s568_s5 = scalar_lea.vmem %s501_s7, 128 }
  0x78   :  { %538 = vmatmul.mubr.msk.f32.vlgmr.msra.gmra.mrb[0].mxu0 %vm67_vm1, %v64_v9  ;;  %v59_v11 = vpop.permute.xlu0 %58  ;;  %p569_p0 = scmp.ne.s32.totalorder %s501_s7, %s568_s5  ;;  %p574_p2 = scmp.lt.s32.totalorder %s568_s5, %s568_s5 }
  0x79   :  { %v62_v12 = vsel %vm57_vm6, %v59_v11, 0.0  ;;  %542 = vmatprep.mubr.msk.f32.mxu0 %vm67_vm1, %v237_v10 }
  0x7a   :  { %540 = vmatprep.subr.msk.mxu0 %vm74_vm0, %v62_v12  ;;  %p575_p3 = por %p574_p2, %p573_p1 }
  0x7b   :  { %541 = vmatpush3.msk.msra.mxu0 %vm74_vm0, %v62_v12 }
  0x7c   :  { %p576_p4 = pnand %p575_p3, %p569_p0 }
  0x80   :  { %543 = vmatmul.mubr.msk.f32.vlgmr.msra.gmra.mrb[0].mxu0 %vm67_vm1, %v238_v13 }
  0xd8   :  { %v534_v14 = vpop.f32.mrb[0].mxu1 }
  0xd9   :  { %v144_v15 = vpop.f32.mrb[1].mxu1 }
 0x153   :  { %v544_v16 = vpop.f32.mrb[0].mxu0 }
 0x154   :  { %v689_v17 = vadd.f32 %v544_v16, %v534_v14  ;;  %v314_v18 = vpop.f32.mrb[1].mxu0 }
 0x155   :  { %v551_v19 = vadd.f32 %v314_v18, %v144_v15 }
 0x156   :  { %v336_v46 = vmul.f32 %v689_v17, %v689_v17 }
 0x157   :  { %329 = vadd.xlane.f32.xlu1 %v551_v19  ;;  %v335_v20 = vmul.f32 %v551_v19, %v551_v19 }
 0x15b   :  { %337 = vadd.xlane.f32.xlu1 %v335_v20 }
 0x1e4   :  { %v330_v22 = vpop.xlane.xlu1 %329 }
 0x1e5   :  { %v333_v23 = vmul.f32 0.03125, %v330_v22 }
 0x1e7   :  { %v343_v25 = vmul.f32 %v333_v23, %v333_v23 }
 0x1e8   :  { %v338_v24 = vpop.xlane.xlu1 %337 }
 0x1e9   :  { %v341_v26 = vmul.f32 0.03125, %v338_v24 }
 0x1eb   :  { %v345_v27 = vsub.f32 %v341_v26, %v343_v25 }
 0x1ed   :  { %v347_v28 = vmax.f32 %v345_v27, 0.0 }
 0x1ef   :  { %v349_v29 = vadd.f32 1e-05, %v347_v28 }
 0x1f1   :  { %562 = vrsqrt.f32 %v349_v29 }
 0x1fb   :  { %v563_v31 = vpop.eup %562 }
 0x1fc   :  { %v353_v32 = vmul.f32 %v563_v31, %v325_v30 }
 0x1fe   :  { %361 = vperm.xlu0 %560, %v353_v32   ;;  %v355_v34 = vmul.f32 %v353_v32, %v333_v23 }
 0x200   :  { %v357_v35 = vsub.f32 %v327_v33, %v355_v34 }
 0x202   :  { %373 = vperm.xlu1 %561, %v357_v35  }
 0x226   :  { %331 = vadd.xlane.f32.xlu1 %v689_v17 }
 0x27d   :  { %v362_v37 = vpop.permute.xlu0 %361 }
 0x27e   :  { %v369_v38 = vmul.f32 %v551_v19, %v362_v37 }
 0x281   :  { %v374_v39 = vpop.permute.xlu1 %373 }
 0x282   :  { %v381_v40 = vadd.f32 %v374_v39, %v369_v38 }
 0x284   :  { %v383_v41 = vmax.f32 %v381_v40, 0.0 }
 0x286   :  { %546 = vmatpush3.msk.msra.mxu1 %vm48_vm2, %v383_v41 }
 0x287   :  { %548 = vmatmul.mubr.msk.f32.vlgmr.msra.gmra.mrb[2].mxu1 %vm388_vm8, %v387_v42 }
 0x2b3   :  { %v332_v49 = vpop.xlane.xlu1 %331 }
 0x2b4   :  { %v334_v51 = vmul.f32 0.03125, %v332_v49 }
 0x2b6   :  { %v344_v56 = vmul.f32 %v334_v51, %v334_v51 }
 0x35a   :  { %v458_v43 = vpop.f32.mrb[2].mxu1 }
 0x35b   :  { %464 = vadd.xlane.f32.xlu0 %v458_v43  ;;  %v549_v44 = vpop.f32.mrb[3].mxu1  ;;  %v467_v45 = vmul.f32 %v458_v43, %v458_v43 }
 0x35f   :  { %468 = vadd.xlane.f32.xlu0 %v467_v45 }
 0x363   :  { %339 = vadd.xlane.f32.xlu0 %v336_v46 }
 0x3e8   :  { %v465_v47 = vpop.xlane.xlu0 %464 }
 0x3e9   :  { %v466_v48 = vmul.f32 0.03125, %v465_v47 }
 0x3eb   :  { %v471_v52 = vmul.f32 %v466_v48, %v466_v48 }
 0x3ec   :  { %v469_v50 = vpop.xlane.xlu0 %468 }
 0x3ed   :  { %v470_v53 = vmul.f32 0.03125, %v469_v50 }
 0x3ef   :  { %v472_v54 = vsub.f32 %v470_v53, %v471_v52 }
 0x3f0   :  { %v340_v55 = vpop.xlane.xlu0 %339 }
 0x3f1   :  { %v473_v57 = vmax.f32 %v472_v54, 0.0  ;;  %v342_v58 = vmul.f32 0.03125, %v340_v55 }
 0x3f3   :  { %v474_v59 = vadd.f32 1e-05, %v473_v57  ;;  %v346_v60 = vsub.f32 %v342_v58, %v344_v56 }
 0x3f5   :  { %564 = vrsqrt.f32 %v474_v59  ;;  %v348_v61 = vmax.f32 %v346_v60, 0.0 }
 0x3f7   :  { %v350_v62 = vadd.f32 1e-05, %v348_v61 }
 0x3f9   :  { %566 = vrsqrt.f32 %v350_v62 }
 0x3ff   :  { %v565_v0 = vpop.eup %564 }
 0x400   :  { %v476_v1 = vmul.f32 %v565_v0, %v462_v63 }
 0x402   :  { %481 = vperm.xlu0 %560, %v476_v1   ;;  %v477_v4 = vmul.f32 %v476_v1, %v466_v48 }
 0x403   :  { %v567_v5 = vpop.eup %566 }
 0x404   :  { %v478_v6 = vsub.f32 %v463_v2, %v477_v4  ;;  %v354_v7 = vmul.f32 %v567_v5, %v326_v3 }
 0x406   :  { %487 = vperm.xlu0 %560, %v478_v6   ;;  %366 = vperm.xlu1 %561, %v354_v7   ;;  %v356_v9 = vmul.f32 %v354_v7, %v334_v51 }
 0x408   :  { %v358_v10 = vsub.f32 %v328_v8, %v356_v9 }
 0x40a   :  { %378 = vperm.xlu1 %561, %v358_v10  }
 0x481   :  { %v482_v11 = vpop.permute.xlu0 %481 }
 0x482   :  { %v484_v12 = vmul.f32 %v482_v11, %v458_v43 }
 0x485   :  { %v488_v13 = vpop.permute.xlu0 %487  ;;  %v367_v14 = vpop.permute.xlu1 %366 }
 0x486   :  { %v490_v15 = vadd.f32 %v488_v13, %v484_v12  ;;  %v370_v16 = vmul.f32 %v689_v17, %v367_v14 }
 0x488   :  { %v491_v19 = vmax.f32 %v490_v15, 0.0 }
 0x489   :  { %v379_v18 = vpop.permute.xlu1 %378 }
 0x48a   :  { %v382_v20 = vadd.f32 %v379_v18, %v370_v16 }
 0x48c   :  { %v492_v21 = vadd.f32 %v491_v19, %v382_v20 }
 0x48e   :  { %493 = vst [vmem:[#allocation2] sm:$0xff] %v492_v21 }
 0x48f   :  { %579 = shalt.err (!%p576_p4)
}
 0x490   :  { %s580_s14 = scalar_lea.hbm %s739_s9, 128 }
 0x491   :  { %p581_p5 = scmp.ne.s32.totalorder %s739_s9, %s580_s14  ;;  %p584_p6 = scmp.lt.u32.totalorder %s580_s14, %s739_s9 }
 0x493   :  { %p586_p7 = pnand %p584_p6, %p581_p5 }
 0x495   :  { %589 = shalt.err (!%p586_p7)
}
 0x496   :  { %503 = dma.vmem_to_hbm [thread:$0]  %s501_s7, 128, %s739_s9, [#allocation3]  }
 0x497   :  { %590 = dma.done.wait [#allocation3], 128  }
 0x498   :  { %591 = vsyncadd [#allocation3], 4294967168 }
 0x499   :  { %507 = vsyncpa [#allocation3], 1 }

</bundles_post_ra>
